<compile_context>
chip_gen: v5e
topology: v5e:2x2
jax: 0.10.0
libtpu: 0.0.40
codegen_flags: <defaults>
</compile_context>

<pallas_src>
import functools

import jax
import jax.numpy as jnp
from jax.experimental import pallas as pl
from jax.experimental.pallas import tpu as pltpu


def _round_up(n, m):
    return ((n + m - 1) // m) * m


def _mlp_kernel(x_ref, w1_ref, b1_ref, w2_ref, b2_ref, w3_ref, b3_ref, o_ref):
    # layer 1: Linear + tanh   (MXU dot, f32 accumulate)
    h1 = jnp.tanh(
        jnp.dot(x_ref[...], w1_ref[...], preferred_element_type=jnp.float32)
        + b1_ref[...]
    )
    # layer 2: Linear + tanh   (MXU dot, f32 accumulate)
    h2 = jnp.tanh(
        jnp.dot(h1.astype(w2_ref.dtype), w2_ref[...],
                preferred_element_type=jnp.float32)
        + b2_ref[...]
    )
    # layer 3 (out_features == 1): VPU broadcast-multiply + lane reduction instead of
    # a degenerate N=1 MXU matmul.  The reduction result is relaid as a lane-dense
    # (1, tb) row (XLU is otherwise idle here) so the output store is lane-aligned.
    logits = jnp.sum(h2 * w3_ref[...], axis=-1)            # (tb,)
    logits = logits.reshape(1, -1) + b3_ref[...]           # (1, tb)
    o_ref[...] = jax.nn.sigmoid(logits).astype(o_ref.dtype)


@functools.partial(jax.jit, static_argnames=("tb", "compute_dtype"))
def l2_binary_classifier(x, w1, b1, w2, b2, w3, b3, *, tb=512,
                         compute_dtype=jnp.float32):
    """Fused 3-layer MLP forward.

    x: (B, D_in).  Weights stored pre-transposed as (in, out); biases (1, out).
    Returns (B, 1) float32.

    tb: batch-tile size (rows per grid step).  Default 512 so per-grid-step overhead
        is amortised; per-step VMEM is only ~tb*(d_in+h1+h2+1)*4 B double-buffered,
        far under the scoped VMEM limit on v5e/v6e/v7x.
    compute_dtype: dtype of the streamed x and the two MXU weight operands
        (jnp.bfloat16 halves x's HBM traffic on v6e/v7x; accumulation stays f32).
    """
    B, d_in = x.shape
    h1_dim = w1.shape[1]
    h2_dim = w2.shape[1]
    d_out = w3.shape[1]
    if d_out != 1:
        # TODO(synk): generalize layer 3 to output_size > 1 (MXU path); the module is
        # a binary classifier and output_size defaults to 1.
        raise NotImplementedError("kernel specialises layer 3 to output_size == 1")

    # ---- effective batch tile -------------------------------------------------
    tb_eff = min(tb, _round_up(B, 8))
    if B > 8 and pl.cdiv(B, tb_eff) < 2:
        # Keep >= 2 grid steps so the "parallel" batch axis can be sharded across
        # the two TensorCores on v7x (megacore).
        tb_eff = _round_up(pl.cdiv(B, 2), 8)
    grid_b = pl.cdiv(B, tb_eff)
    b_pad = grid_b * tb_eff

    xp = x.astype(compute_dtype)
    if b_pad != B:
        xp = jnp.pad(xp, ((0, b_pad - B), (0, 0)))  # zero rows, sliced off below

    w1c = w1.astype(compute_dtype)
    w2c = w2.astype(compute_dtype)
    w3_row = w3.reshape(1, h2_dim).astype(jnp.float32)   # (1, h2) row for VPU path
    b1r = b1.reshape(1, h1_dim).astype(jnp.float32)
    b2r = b2.reshape(1, h2_dim).astype(jnp.float32)
    b3r = b3.reshape(1, 1).astype(jnp.float32)

    out_rows = pl.pallas_call(
        _mlp_kernel,
        out_shape=jax.ShapeDtypeStruct((grid_b, tb_eff), jnp.float32),
        grid=(grid_b,),
        in_specs=[
            pl.BlockSpec((tb_eff, d_in), lambda i: (i, 0)),    # x: streamed over batch
            pl.BlockSpec((d_in, h1_dim), lambda i: (0, 0)),    # W1 (resident)
            pl.BlockSpec((1, h1_dim), lambda i: (0, 0)),       # b1
            pl.BlockSpec((h1_dim, h2_dim), lambda i: (0, 0)),  # W2 (resident)
            pl.BlockSpec((1, h2_dim), lambda i: (0, 0)),       # b2
            pl.BlockSpec((1, h2_dim), lambda i: (0, 0)),       # W3 as a row
            pl.BlockSpec((1, 1), lambda i: (0, 0)),            # b3
        ],
        out_specs=pl.BlockSpec((1, tb_eff), lambda i: (i, 0)),  # lane-dense row/step
        compiler_params=pltpu.CompilerParams(
            dimension_semantics=("parallel",)),
    )(xp, w1c, b1r, w2c, b2r, w3_row, b3r)

    # (grid_b, tb) row-major == batch order; drop padded rows, restore (B, 1).
    return out_rows.reshape(b_pad, 1)[:B]


def init_params(key, input_size, hidden_size_1, hidden_size_2, output_size=1):
    """Xavier-uniform weights, uniform(+-1/sqrt(fan_in)) biases (nn.Linear-style).
    Weights stored (in, out); biases (1, out)."""
    def xavier(k, fan_in, fan_out):
        limit = jnp.sqrt(6.0 / (fan_in + fan_out))
        return jax.random.uniform(k, (fan_in, fan_out), jnp.float32, -limit, limit)

    def bias(k, fan_in, fan_out):
        bound = 1.0 / jnp.sqrt(fan_in)
        return jax.random.uniform(k, (1, fan_out), jnp.float32, -bound, bound)

    ks = jax.random.split(key, 6)
    w1 = xavier(ks[0], input_size, hidden_size_1)
    b1 = bias(ks[1], input_size, hidden_size_1)
    w2 = xavier(ks[2], hidden_size_1, hidden_size_2)
    b2 = bias(ks[3], hidden_size_1, hidden_size_2)
    w3 = xavier(ks[4], hidden_size_2, output_size)
    b3 = bias(ks[5], hidden_size_2, output_size)
    return w1, b1, w2, b2, w3, b3


def reference_forward(x, w1, b1, w2, b2, w3, b3):
    h = jnp.tanh(x @ w1 + b1)
    h = jnp.tanh(h @ w2 + b2)
    return jax.nn.sigmoid(h @ w3 + b3)


if __name__ == "__main__":
    key = jax.random.PRNGKey(0)
    k_x, k_p, k_x2 = jax.random.split(key, 3)

    # Small shapes consistent with the module (input_size is lazily inferred in torch;
    # fixed here).
    batch = 8
    input_size = 32
    hidden_size_1 = 64
    hidden_size_2 = 32
    output_size = 1

    x = jax.random.normal(k_x, (batch, input_size), jnp.float32)
    params = init_params(k_p, input_size, hidden_size_1, hidden_size_2, output_size)

    y = jax.block_until_ready(l2_binary_classifier(x, *params))
    y_ref = reference_forward(x, *params)
    assert y.shape == (batch, output_size)
    assert jnp.allclose(y, y_ref, atol=1e-5, rtol=1e-5)

    # Moderate batch: exercises the tiled grid (2 steps, megacore-shardable), the
    # lane-dense (1, tb) output rows, and the remainder-padding path (1000 -> 1024).
    batch2 = 1000
    x2 = jax.random.normal(k_x2, (batch2, input_size), jnp.float32)
    y2 = jax.block_until_ready(l2_binary_classifier(x2, *params, tb=512))
    y2_ref = reference_forward(x2, *params)
    assert y2.shape == (batch2, output_size)
    assert jnp.allclose(y2, y2_ref, atol=1e-5, rtol=1e-5)

    print("KERNEL_OK")
</pallas_src>

<mosaic_0001>
module attributes {stable_mosaic.version = 11 : i64} {
  func.func @_mlp_kernel(%arg0: i32, %arg1: memref<8x32xf32, #tpu.memory_space<vmem>>, %arg2: memref<32x64xf32, #tpu.memory_space<vmem>>, %arg3: memref<1x64xf32, #tpu.memory_space<vmem>>, %arg4: memref<64x32xf32, #tpu.memory_space<vmem>>, %arg5: memref<1x32xf32, #tpu.memory_space<vmem>>, %arg6: memref<1x32xf32, #tpu.memory_space<vmem>>, %arg7: memref<1x1xf32, #tpu.memory_space<vmem>>, %arg8: memref<1x8xf32, #tpu.memory_space<vmem>>) attributes {dimension_semantics = [#tpu.dimension_semantics<parallel>], iteration_bounds = array<i64: 1>, scalar_prefetch = 0 : i64, scratch_operands = 0 : i64, tpu.core_type = #tpu.core_type<tc>, window_params = [{transform_indices = @transform_0, window_bounds = array<i64: 8, 32>}, {pipeline_mode = #tpu.pipeline_mode<synchronous>, transform_indices = @transform_1, window_bounds = array<i64: 32, 64>}, {pipeline_mode = #tpu.pipeline_mode<synchronous>, transform_indices = @transform_2, window_bounds = array<i64: 1, 64>}, {pipeline_mode = #tpu.pipeline_mode<synchronous>, transform_indices = @transform_3, window_bounds = array<i64: 64, 32>}, {pipeline_mode = #tpu.pipeline_mode<synchronous>, transform_indices = @transform_4, window_bounds = array<i64: 1, 32>}, {pipeline_mode = #tpu.pipeline_mode<synchronous>, transform_indices = @transform_5, window_bounds = array<i64: 1, 32>}, {pipeline_mode = #tpu.pipeline_mode<synchronous>, transform_indices = @transform_6, window_bounds = array<i64: 1, 1>}, {transform_indices = @transform_7, window_bounds = array<i64: 1, 8>}]} {
    %c0 = arith.constant 0 : index
    %c0_0 = arith.constant 0 : index
    %0 = vector.load %arg1[%c0, %c0_0] : memref<8x32xf32, #tpu.memory_space<vmem>>, vector<8x32xf32>
    %c0_1 = arith.constant 0 : index
    %c0_2 = arith.constant 0 : index
    %1 = vector.load %arg2[%c0_1, %c0_2] : memref<32x64xf32, #tpu.memory_space<vmem>>, vector<32x64xf32>
    %cst = arith.constant dense<0.000000e+00> : vector<8x64xf32>
    %2 = tpu.matmul %0, %1, %cst {dimension_numbers = #tpu.dot_dimension_numbers<[1], [0], [0], [1], [0, 0, 1, 1], [], []>} : vector<8x32xf32>, vector<32x64xf32>, vector<8x64xf32> -> vector<8x64xf32>
    %c0_3 = arith.constant 0 : index
    %c0_4 = arith.constant 0 : index
    %3 = vector.load %arg3[%c0_3, %c0_4] : memref<1x64xf32, #tpu.memory_space<vmem>>, vector<1x64xf32>
    %4 = vector.broadcast %3 : vector<1x64xf32> to vector<8x64xf32>
    %5 = arith.addf %2, %4 : vector<8x64xf32>
    %6 = math.tanh %5 : vector<8x64xf32>
    %c0_5 = arith.constant 0 : index
    %c0_6 = arith.constant 0 : index
    %7 = vector.load %arg4[%c0_5, %c0_6] : memref<64x32xf32, #tpu.memory_space<vmem>>, vector<64x32xf32>
    %cst_7 = arith.constant dense<0.000000e+00> : vector<8x32xf32>
    %8 = tpu.matmul %6, %7, %cst_7 {dimension_numbers = #tpu.dot_dimension_numbers<[1], [0], [0], [1], [0, 0, 1, 1], [], []>} : vector<8x64xf32>, vector<64x32xf32>, vector<8x32xf32> -> vector<8x32xf32>
    %c0_8 = arith.constant 0 : index
    %c0_9 = arith.constant 0 : index
    %9 = vector.load %arg5[%c0_8, %c0_9] : memref<1x32xf32, #tpu.memory_space<vmem>>, vector<1x32xf32>
    %10 = vector.broadcast %9 : vector<1x32xf32> to vector<8x32xf32>
    %11 = arith.addf %8, %10 : vector<8x32xf32>
    %12 = math.tanh %11 : vector<8x32xf32>
    %c0_10 = arith.constant 0 : index
    %c0_11 = arith.constant 0 : index
    %13 = vector.load %arg6[%c0_10, %c0_11] : memref<1x32xf32, #tpu.memory_space<vmem>>, vector<1x32xf32>
    %14 = vector.broadcast %13 : vector<1x32xf32> to vector<8x32xf32>
    %15 = arith.mulf %12, %14 : vector<8x32xf32>
    %cst_12 = arith.constant dense<0.000000e+00> : vector<8xf32>
    %16 = vector.multi_reduction <add>, %15, %cst_12 [1] : vector<8x32xf32> to vector<8xf32>
    %17 = vector.shape_cast %16 : vector<8xf32> to vector<1x8xf32>
    %c0_13 = arith.constant 0 : index
    %c0_14 = arith.constant 0 : index
    %18 = vector.load %arg7[%c0_13, %c0_14] : memref<1x1xf32, #tpu.memory_space<vmem>>, vector<1x1xf32>
    %19 = vector.broadcast %18 : vector<1x1xf32> to vector<1x8xf32>
    %20 = arith.addf %17, %19 : vector<1x8xf32>
    %21 = arith.negf %20 : vector<1x8xf32>
    %22 = math.exp %21 : vector<1x8xf32>
    %cst_15 = arith.constant 1.000000e+00 : f32
    %23 = vector.broadcast %cst_15 : f32 to vector<1x8xf32>
    %24 = arith.addf %23, %22 : vector<1x8xf32>
    %25 = arith.divf %23, %24 : vector<1x8xf32>
    %c0_16 = arith.constant 0 : index
    %c0_17 = arith.constant 0 : index
    %26 = vector.load %arg8[%c0_16, %c0_17] : memref<1x8xf32, #tpu.memory_space<vmem>>, vector<1x8xf32>
    tpu.vector_store %arg8[%c0_16, %c0_17], %25 {strides = array<i32>} : memref<1x8xf32, #tpu.memory_space<vmem>>, vector<1x8xf32>,
    return
  }
  func.func @transform_0(%arg0: i32) -> (i32, i32) {
    %c0_i32 = arith.constant 0 : i32
    %c0_i32_0 = arith.constant 0 : i32
    return %arg0, %c0_i32 : i32, i32
  }
  func.func @transform_1(%arg0: i32) -> (i32, i32) {
    %c0_i32 = arith.constant 0 : i32
    %c0_i32_0 = arith.constant 0 : i32
    %c0_i32_1 = arith.constant 0 : i32
    return %c0_i32, %c0_i32_0 : i32, i32
  }
  func.func @transform_2(%arg0: i32) -> (i32, i32) {
    %c0_i32 = arith.constant 0 : i32
    %c0_i32_0 = arith.constant 0 : i32
    %c0_i32_1 = arith.constant 0 : i32
    return %c0_i32, %c0_i32_0 : i32, i32
  }
  func.func @transform_3(%arg0: i32) -> (i32, i32) {
    %c0_i32 = arith.constant 0 : i32
    %c0_i32_0 = arith.constant 0 : i32
    %c0_i32_1 = arith.constant 0 : i32
    return %c0_i32, %c0_i32_0 : i32, i32
  }
  func.func @transform_4(%arg0: i32) -> (i32, i32) {
    %c0_i32 = arith.constant 0 : i32
    %c0_i32_0 = arith.constant 0 : i32
    %c0_i32_1 = arith.constant 0 : i32
    return %c0_i32, %c0_i32_0 : i32, i32
  }
  func.func @transform_5(%arg0: i32) -> (i32, i32) {
    %c0_i32 = arith.constant 0 : i32
    %c0_i32_0 = arith.constant 0 : i32
    %c0_i32_1 = arith.constant 0 : i32
    return %c0_i32, %c0_i32_0 : i32, i32
  }
  func.func @transform_6(%arg0: i32) -> (i32, i32) {
    %c0_i32 = arith.constant 0 : i32
    %c0_i32_0 = arith.constant 0 : i32
    %c0_i32_1 = arith.constant 0 : i32
    return %c0_i32, %c0_i32_0 : i32, i32
  }
  func.func @transform_7(%arg0: i32) -> (i32, i32) {
    %c0_i32 = arith.constant 0 : i32
    %c0_i32_0 = arith.constant 0 : i32
    return %arg0, %c0_i32 : i32, i32
  }
}

</mosaic_0001>

<bundles_post_ra>
// kernel: l2_binary_classifier.1
= control target key start
LH: loop header
LB: loop body
LE: loop exit
PB: predicated region body
PF: predicated region fallthrough
CT: control target
= control target key end

     0   :  { %s299_s0 = inlined_call_operand.vmem [shape: f32[8,32], index: 0, kind: input, shape index: {}]   ;;  %s300_s1 = inlined_call_operand.vmem [shape: f32[32,64], index: 1, kind: input, shape index: {}]   ;;  %s301_s2 = inlined_call_operand.vmem [shape: f32[1,64], index: 2, kind: input, shape index: {}]   ;;  %s302_s3 = inlined_call_operand.vmem [shape: f32[64,32], index: 3, kind: input, shape index: {}]   ;;  %s303_s4 = inlined_call_operand.vmem [shape: f32[1,32], index: 4, kind: input, shape index: {}]   ;;  %s304_s5 = inlined_call_operand.vmem [shape: f32[1,32], index: 5, kind: input, shape index: {}]   ;;  %s305_s6 = inlined_call_operand.<no memory space> [shape: f32[1,1], index: 6, kind: input, shape index: {}]   ;;  %s306_s7 = inlined_call_operand.hbm [shape: f32[1,8], index: 7, kind: output, shape index: {}]  }
   0x1   :  { %v12_v0 = vstv %s305_s6 }
   0x2   :  { %13 = vst [vmem:[#allocation2] sm:$0x1] %v12_v0 }
   0x3   :  { %v33_v1 = vld [vmem:[%s300_s1 + $0x18] sm:$0xff]  ;;  %v32_v2 = vld [vmem:[%s300_s1 + $0x10] sm:$0xff]  ;;  %v31_v4 = vld [vmem:[%s300_s1 + $0x8] sm:$0xff] }
   0x4   :  { %54 = vmatpush.msra.mxu0 %v33_v1  ;;  %v70_v3 = vld [vmem:[%s302_s3 + $0x38] sm:$0xff]  ;;  %v69_v5 = vld [vmem:[%s302_s3 + $0x30] sm:$0xff]  ;;  %v68_v6 = vld [vmem:[%s302_s3 + $0x28] sm:$0xff] }
   0x5   :  { %87 = vmatpush.msra.mxu1 %v70_v3  ;;  %v30_v7 = vld [vmem:[%s300_s1] sm:$0xff] }
   0x6   :  { %55 = vmatpush.msra.mxu0 %v32_v2 }
   0x7   :  { %88 = vmatpush.msra.mxu1 %v69_v5 }
   0x8   :  { %14 = vsyncpa [#allocation4], 0  ;;  %56 = vmatpush.msra.mxu0 %v31_v4  ;;  %v29_v8 = vld [vmem:[%s299_s0] sm:$0xff]  ;;  %vm38_vm0 = vcmask 261120   ;;  %v66_v10 = vld [vmem:[%s302_s3 + $0x18] sm:$0xff]  ;;  %v201_v15 = vmov 0   ;;  %v136_v37 = vlaneseq }
   0x9   :  { %89 = vmatpush.msra.mxu1 %v68_v6  ;;  %v67_v9 = vld [vmem:[%s302_s3 + $0x20] sm:$0xff]  ;;  %v65_v11 = vld [vmem:[%s302_s3 + $0x10] sm:$0xff]  ;;  %v64_v12 = vld [vmem:[%s302_s3 + $0x8] sm:$0xff]  ;;  %163 = vset.pattern.permute.xlu0 %v201_v15  ;;  %vm75_vm1 = vcmask 523264   ;;  %s149_s9 = sshll.u32 %s306_s7, 4  ;;  %vm140_vm6 = vcmask 57344   ;;  %s150_s9 = int_to_ptr.hbm [resolvable:$true] %s149_s9 }
   0xa   :  { %57 = vmatpush.msra.mxu0 %v30_v7  ;;  %v63_v13 = vld [vmem:[%s302_s3] sm:$0xff]  ;;  %v137_v42 = vand.u32 127, %v136_v37 }
   0xb   :  { %158 = vmatmul.msk.f32.vlgmr.msra.gmra.mxu0 %vm38_vm0, %v29_v8  ;;  %90 = vmatpush.msra.mxu1 %v67_v9  ;;  %v108_v14 = vld [vmem:[#allocation2] sm:$0x1] }
   0xc   :  { %111 = vperm.xlu0 %163, %v108_v14   ;;  %v164_v16 = vld [vmem:[%s301_s2] ss:$0 sm:$0xff]  ;;  %s202_s2 = smov [#allocation3]  }
   0xd   :  { %91 = vmatpush.msra.mxu1 %v66_v10  ;;  %v165_v20 = vld [vmem:[%s303_s4] ss:$0 sm:$0xff]  ;;  %s147_s4 = sshll.u32 %s202_s2, 4  ;;  %s148_s4 = int_to_ptr.vmem [resolvable:$true] %s147_s4 }
   0xe   :  { %v166_v23 = vld [vmem:[%s304_s5] ss:$0 sm:$0xff] }
   0xf   :  { %92 = vmatpush.msra.mxu1 %v65_v11 }
  0x11   :  { %93 = vmatpush.msra.mxu1 %v64_v12 }
  0x13   :  { %94 = vmatpush.msra.mxu1 %v63_v13 }
  0x7e   :  { %v112_v27 = vpop.permute.xlu0 %111 }
  0x7f   :  { %v114_v28 = vperm.slane %v112_v27, 0 }
  0x88   :  { %v59_v17 = vpop.f32.mrf.mxu0 }
  0x89   :  { %v60_v18 = vadd.f32 %v164_v16, %v59_v17 }
  0x8b   :  { %167 = vtanh.f32 %v60_v18 }
  0x91   :  { %v168_v19 = vpop.eup %167 }
  0x92   :  { %159 = vmatmul.msk.f32.vlgmr.msra.gmra.mxu1 %vm75_vm1, %v168_v19 }
 0x10f   :  { %v96_v21 = vpop.f32.mrf.mxu1 }
 0x110   :  { %v97_v22 = vadd.f32 %v165_v20, %v96_v21 }
 0x112   :  { %169 = vtanh.f32 %v97_v22 }
 0x118   :  { %v170_v24 = vpop.eup %169 }
 0x119   :  { %v104_v25 = vmul.f32 %v170_v24, %v166_v23 }
 0x11b   :  { %v105_v26 = vsel %vm38_vm0, %v104_v25, 0.0 }
 0x11c   :  { %106 = vadd.xlane.f32.xlu0 %v105_v26 }
 0x18f   :  { %v107_v29 = vpop.xlane.xlu0 %106 }
 0x190   :  { %v115_v30 = vadd.f32 %v114_v28, %v107_v29 }
 0x192   :  { %v160_v31 = vmul.f32 -1.442695, %v115_v30 }
 0x194   :  { %171 = vpow2.f32 %v160_v31 }
 0x19a   :  { %v172_v32 = vpop.eup %171 }
 0x19b   :  { %v119_v33 = vadd.f32 1.0, %v172_v32 }
 0x19d   :  { %173 = vrcp.f32 %v119_v33  ;;  %v131_v38 = vand.u32 2147483648, %v119_v33  ;;  %v129_v40 = vand.u32 2147483647, %v119_v33  ;;  %vm125_vm3 = vweird.f32 %v119_v33 }
 0x19f   :  { %v132_v43 = vor.u32 1.1754944e-38, %v131_v38  ;;  %vm130_vm5 = vcmp.eq.f32.partialorder %v129_v40, 8.507059e+37 }
 0x1a3   :  { %v174_v34 = vpop.eup %173 }
 0x1a4   :  { %v121_v35 = vmul.f32 %v174_v34, %v119_v33  ;;  %vm126_vm2 = vweird.f32 %v174_v34 }
 0x1a5   :  { %vm127_vm4 = vmor %vm125_vm3, %vm126_vm2 }
 0x1a6   :  { %v122_v36 = vsub.f32 1.0, %v121_v35 }
 0x1a8   :  { %v123_v39 = vmul.f32 %v174_v34, %v122_v36 }
 0x1aa   :  { %v124_v41 = vadd.f32 %v174_v34, %v123_v39 }
 0x1ac   :  { %v128_v44 = vsel %vm127_vm4, %v174_v34, %v124_v41 }
 0x1ad   :  { %v133_v45 = vsel %vm130_vm5, %v132_v43, %v128_v44 }
 0x1ae   :  { %v138_v46 = vperm.slane %v133_v45, %v137_v42 }
 0x1b0   :  { %141 = vst.msk [vmem:[#allocation3] sm:$0x1] %vm140_vm6, %v138_v46 }
 0x1b1   :  { %152 = dma.vmem_to_hbm [thread:$0]  %s148_s4, 16, %s150_s9, [#allocation4]  }
 0x1b2   :  { %199 = dma.done.wait [#allocation4], 16  }
 0x1b3   :  { %200 = vsyncadd [#allocation4], 4294967280 }
 0x1b4   :  { %157 = vsyncpa [#allocation4], 1 }

</bundles_post_ra>
